<compile_context>
chip_gen: v7x
topology: tpu7x:2x2x1
jax: 0.10.0
libtpu: 0.0.40
codegen_flags: <defaults>
</compile_context>

<pallas_src>
import jax
import jax.numpy as jnp
from jax import lax
from jax.experimental import pallas as pl
from jax.experimental.pallas import tpu as pltpu


def _round_up(x, m):
    return (x + m - 1) // m * m


def _vmem_limit_bytes():
    # Generation-aware scoped-VMEM limit: ~3/4 of physical, capped at 96 MiB
    # (v5e/v6e: 128 MiB physical -> 96 MiB; v7x: 64 MiB physical -> 48 MiB).
    try:
        cap = int(pltpu.get_tpu_info().vmem_capacity_bytes)
    except Exception:
        cap = 64 * 1024 * 1024          # conservative (v7x-sized) fallback
    return min(cap * 3 // 4, 96 * 1024 * 1024)


def _pick_row_tile(n_pad, vmem_limit_bytes, x_itemsize, emit_mask):
    # Per-element VMEM bytes of a (tm, n_pad) row slab:
    #   double-buffered input blocks: x (2*itemsize) + 2 int8 masks (4 B)
    #   double-buffered int8 mask output block (2 B, optional)
    #   ~4 live f32 temporaries (x_f32, mask_f, e, q ~ 16 B)
    per_elem = 2 * x_itemsize + 4 + (2 if emit_mask else 0) + 16
    budget = int(vmem_limit_bytes * 0.8)
    for tm in (512, 256, 128, 64, 32):
        if tm <= n_pad and n_pad % tm == 0 and tm * n_pad * per_elem <= budget:
            return tm
    return 32


def _make_kernel(n, n_pad, tm, temperature, vn_threshold, fast_mask, emit_mask):
    inv_temp = 1.0 / float(temperature)
    g_shift = inv_temp                 # |x| <= 1  ->  x/T <= 1/T : exact LSE shift
    thr = float(vn_threshold)
    needs_pad = n_pad != n

    def body(x_ref, mv_ref, mn_ref, parts_ref, maskb_ref):
        i = pl.program_id(0)

        x = x_ref[...].astype(jnp.float32)          # bf16/f32 HBM -> f32 compute
        base = mv_ref[...].astype(jnp.float32) * mn_ref[...].astype(jnp.float32)

        # Diagonal of the global matrix restricted to this row tile: narrow
        # iotas + one full-tile compare (no full-tile int32 iota pair).
        col_ids = lax.broadcasted_iota(jnp.int32, (1, n_pad), 1)
        row_ids = lax.broadcasted_iota(jnp.int32, (tm, 1), 0) + i * tm
        diag_b = col_ids == row_ids                 # (tm, n_pad) bool

        if fast_mask:
            # 0/1 masks and 0 <= thr < 1:  (mv*mn + eye) > thr  ==  eye ? 1 : mv*mn
            mask_f = jnp.where(diag_b, 1.0, base)
        else:
            mask_f = ((base + diag_b.astype(jnp.float32)) > thr).astype(jnp.float32)

        # Single exp pass shared by the row and column LSEs.
        e = jnp.exp((x - 1.0) * inv_temp)

        if needs_pad:
            valid = jnp.logical_and(row_ids < n, col_ids < n)
            mask_f = jnp.where(valid, mask_f, 0.0)
            e = jnp.where(valid, e, 0.0)

        if emit_mask:
            maskb_ref[...] = mask_f.astype(jnp.int8)

        q = x * mask_f                              # un-scaled; 1/T folded later

        # ---- row branch (loss_i): fully reduced to a per-tile scalar ----
        rows_q = jnp.sum(q, axis=1, keepdims=True)            # (tm, 1)
        rows_cnt = jnp.sum(mask_f, axis=1, keepdims=True)
        rows_lse = jnp.log(jnp.sum(e, axis=1, keepdims=True)) + g_shift
        idiag = jnp.where(rows_cnt > 0.0,
                          inv_temp * rows_q / rows_cnt - rows_lse, 0.0)
        li = jnp.sum(idiag, axis=0, keepdims=True)             # (1, 1)

        # ---- column branch partials for this row tile (combined outside) ----
        col_q = jnp.sum(q, axis=0, keepdims=True)              # (1, n_pad)
        col_cnt = jnp.sum(mask_f, axis=0, keepdims=True)
        col_e = jnp.sum(e, axis=0, keepdims=True)
        li_row = jnp.broadcast_to(li, (1, n_pad))

        parts_ref[0:1, :] = col_q
        parts_ref[1:2, :] = col_cnt
        parts_ref[2:3, :] = col_e
        parts_ref[3:4, :] = li_row

    if emit_mask:
        def kernel(x_ref, mv_ref, mn_ref, parts_ref, maskb_ref):
            body(x_ref, mv_ref, mn_ref, parts_ref, maskb_ref)
    else:
        def kernel(x_ref, mv_ref, mn_ref, parts_ref):
            body(x_ref, mv_ref, mn_ref, parts_ref, None)
    return kernel


def egonce_loss(x, mask_v, mask_n, temperature=0.07, vn_threshold=0.0,
                return_mask=True):
    """EgoNCE.forward (multi_pad_mask=None). Returns (loss, mask_bool) or loss."""
    n, m = x.shape
    assert n == m, "EgoNCE default branch adds eye(N); requires square similarity"

    if not jnp.issubdtype(x.dtype, jnp.floating):
        x = x.astype(jnp.float32)
    # NOTE: x is kept in its (narrow, bf16-recommended) HBM dtype; f32 in-kernel.

    def _is_binary_dtype(a):
        return (jnp.issubdtype(a.dtype, jnp.integer)
                or jnp.issubdtype(a.dtype, jnp.bool_))

    thr = float(vn_threshold)
    fast_mask = (0.0 <= thr < 1.0) and _is_binary_dtype(mask_v) and _is_binary_dtype(mask_n)

    n_pad = _round_up(n, 128)
    if n_pad != n:
        pad = ((0, n_pad - n), (0, n_pad - n))
        x = jnp.pad(x, pad)
        mask_v = jnp.pad(mask_v, pad)
        mask_n = jnp.pad(mask_n, pad)

    vmem_limit = _vmem_limit_bytes()
    tm = _pick_row_tile(n_pad, vmem_limit, x.dtype.itemsize, return_mask)
    n_tiles = n_pad // tm

    kernel = _make_kernel(n, n_pad, tm, float(temperature), thr,
                          fast_mask, return_mask)

    row_spec = pl.BlockSpec((tm, n_pad), lambda i: (i, 0))
    parts_sds = jax.ShapeDtypeStruct((4, n_tiles * n_pad), jnp.float32)
    parts_spec = pl.BlockSpec((4, n_pad), lambda i: (0, i))

    if return_mask:
        out_shape = (parts_sds, jax.ShapeDtypeStruct((n_pad, n_pad), jnp.int8))
        out_specs = (parts_spec, row_spec)
    else:
        out_shape = parts_sds
        out_specs = parts_spec

    res = pl.pallas_call(
        kernel,
        out_shape=out_shape,
        grid=(n_tiles,),
        in_specs=[row_spec, row_spec, row_spec],
        out_specs=out_specs,
        compiler_params=pltpu.CompilerParams(
            dimension_semantics=("parallel",),   # independent tiles -> megacore
            vmem_limit_bytes=int(vmem_limit),
        ),
    )(x, mask_v, mask_n)

    if return_mask:
        parts, mask_i8 = res
    else:
        parts = res

    # Tiny O(n_tiles * n_pad) combine (column LSE + final scalar) in XLA.
    inv_temp = 1.0 / float(temperature)
    g_shift = inv_temp
    parts = parts.reshape(4, n_tiles, n_pad)
    col_q = jnp.sum(parts[0, :, :n], axis=0)
    col_cnt = jnp.sum(parts[1, :, :n], axis=0)
    col_e = jnp.sum(parts[2, :, :n], axis=0)
    li_sum = jnp.sum(parts[3, :, 0])

    col_lse = jnp.log(col_e) + g_shift
    jdiag = inv_temp * col_q / col_cnt - col_lse
    loss = -(li_sum + jnp.sum(jdiag)) / n

    if not return_mask:
        return loss
    mask_bool = mask_i8[:n, :n].astype(jnp.bool_)
    return loss, mask_bool


def _reference(x, mask_v, mask_n, temperature=0.07, vn_threshold=0.0):
    x = x.astype(jnp.float32)
    mv = mask_v.astype(jnp.float32)
    mn = mask_n.astype(jnp.float32)
    n = x.shape[0]
    mask = mv * mn + jnp.eye(n, dtype=jnp.float32)
    mask_bool = mask > vn_threshold
    mask_f = mask_bool.astype(jnp.float32)
    i_sm = x / temperature
    j_sm = x.T / temperature
    idiag = jnp.sum(jax.nn.log_softmax(i_sm, axis=1) * mask_f, axis=1) / mask_f.sum(-1)
    loss_i = idiag.sum() / idiag.shape[0]
    jdiag = jnp.sum(jax.nn.log_softmax(j_sm, axis=1) * mask_f.T, axis=1) / mask_f.sum(0)
    loss_j = jdiag.sum() / jdiag.shape[0]
    return -loss_i - loss_j, mask_bool


if __name__ == "__main__":
    key = jax.random.PRNGKey(0)

    # N=16 exercises the padded (16 -> 128) lane-dense path with grid=(1,);
    # N=384 exercises the unpadded multi-tile "parallel" path (3 row tiles).
    for N in (16, 384):
        k1, k2, k3, key = jax.random.split(key, 4)
        # Synthetic cosine-similarity matrix in [-1, 1]; bf16 in HBM, f32 math.
        x = jnp.tanh(jax.random.normal(k1, (N, N), dtype=jnp.float32)).astype(jnp.bfloat16)
        # Binary verb / noun co-occurrence masks as int8 (cheap HBM I/O).
        mask_v = (jax.random.uniform(k2, (N, N)) > 0.6).astype(jnp.int8)
        mask_n = (jax.random.uniform(k3, (N, N)) > 0.6).astype(jnp.int8)

        loss, mask_bool = egonce_loss(x, mask_v, mask_n,
                                      temperature=0.07, vn_threshold=0.0)
        loss = jax.block_until_ready(loss)
        mask_bool = jax.block_until_ready(mask_bool)

        ref_loss, ref_mask = _reference(x, mask_v, mask_n)
        assert jnp.allclose(loss, ref_loss, rtol=1e-4, atol=1e-4), (N, loss, ref_loss)
        assert bool(jnp.all(mask_bool == ref_mask)), N

        # Mask-less fast path (skips the int8 output / vst traffic entirely).
        loss_only = egonce_loss(x, mask_v, mask_n, temperature=0.07,
                                vn_threshold=0.0, return_mask=False)
        loss_only = jax.block_until_ready(loss_only)
        assert jnp.allclose(loss_only, ref_loss, rtol=1e-4, atol=1e-4), (N, loss_only, ref_loss)

    print("KERNEL_OK")
</pallas_src>

<mosaic_0001>
module attributes {stable_mosaic.version = 11 : i64} {
  func.func @kernel(%arg0: i32, %arg1: memref<128x128xbf16, #tpu.memory_space<vmem>>, %arg2: memref<128x128xi8, #tpu.memory_space<vmem>>, %arg3: memref<128x128xi8, #tpu.memory_space<vmem>>, %arg4: memref<4x128xf32, #tpu.memory_space<vmem>>, %arg5: memref<128x128xi8, #tpu.memory_space<vmem>>) attributes {dimension_semantics = [#tpu.dimension_semantics<parallel>], iteration_bounds = array<i64: 1>, scalar_prefetch = 0 : i64, scratch_operands = 0 : i64, tpu.core_type = #tpu.core_type<tc>, window_params = [{transform_indices = @transform_0, window_bounds = array<i64: 128, 128>}, {transform_indices = @transform_1, window_bounds = array<i64: 128, 128>}, {transform_indices = @transform_2, window_bounds = array<i64: 128, 128>}, {transform_indices = @transform_3, window_bounds = array<i64: 4, 128>}, {transform_indices = @transform_4, window_bounds = array<i64: 128, 128>}]} {
    %c0 = arith.constant 0 : index
    %c0_0 = arith.constant 0 : index
    %0 = vector.load %arg1[%c0, %c0_0] : memref<128x128xbf16, #tpu.memory_space<vmem>>, vector<128x128xbf16>
    %1 = arith.extf %0 : vector<128x128xbf16> to vector<128x128xf32>
    %c0_1 = arith.constant 0 : index
    %c0_2 = arith.constant 0 : index
    %2 = vector.load %arg2[%c0_1, %c0_2] : memref<128x128xi8, #tpu.memory_space<vmem>>, vector<128x128xi8>
    %3 = arith.sitofp %2 : vector<128x128xi8> to vector<128x128xf32>
    %c0_3 = arith.constant 0 : index
    %c0_4 = arith.constant 0 : index
    %4 = vector.load %arg3[%c0_3, %c0_4] : memref<128x128xi8, #tpu.memory_space<vmem>>, vector<128x128xi8>
    %5 = arith.sitofp %4 : vector<128x128xi8> to vector<128x128xf32>
    %6 = arith.mulf %3, %5 : vector<128x128xf32>
    %7 = tpu.iota {dimensions = array<i32: 1>} : vector<1x128xi32>
    %8 = tpu.iota {dimensions = array<i32: 0>} : vector<128x1xi32>
    %c128_i32 = arith.constant 128 : i32
    %9 = arith.muli %arg0, %c128_i32 : i32
    %10 = vector.broadcast %9 : i32 to vector<128x1xi32>
    %11 = arith.addi %8, %10 : vector<128x1xi32>
    %12 = vector.broadcast %7 : vector<1x128xi32> to vector<128x128xi32>
    %13 = vector.broadcast %11 : vector<128x1xi32> to vector<128x128xi32>
    %14 = arith.cmpi eq, %12, %13 : vector<128x128xi32>
    %cst = arith.constant 1.000000e+00 : f32
    %15 = vector.broadcast %cst : f32 to vector<128x128xf32>
    %16 = arith.select %14, %15, %6 : vector<128x128xi1>, vector<128x128xf32>
    %cst_5 = arith.constant 1.000000e+00 : f32
    %17 = vector.broadcast %cst_5 : f32 to vector<128x128xf32>
    %18 = arith.subf %1, %17 : vector<128x128xf32>
    %cst_6 = arith.constant 14.2857141 : f32
    %19 = vector.broadcast %cst_6 : f32 to vector<128x128xf32>
    %20 = arith.mulf %18, %19 : vector<128x128xf32>
    %21 = math.exp %20 : vector<128x128xf32>
    %c16_i32 = arith.constant 16 : i32
    %22 = vector.broadcast %c16_i32 : i32 to vector<128x1xi32>
    %23 = arith.cmpi slt, %11, %22 : vector<128x1xi32>
    %c16_i32_7 = arith.constant 16 : i32
    %24 = vector.broadcast %c16_i32_7 : i32 to vector<1x128xi32>
    %25 = arith.cmpi slt, %7, %24 : vector<1x128xi32>
    %26 = vector.broadcast %23 : vector<128x1xi1> to vector<128x128xi1>
    %27 = vector.broadcast %25 : vector<1x128xi1> to vector<128x128xi1>
    %28 = arith.andi %26, %27 : vector<128x128xi1>
    %cst_8 = arith.constant 0.000000e+00 : f32
    %29 = vector.broadcast %cst_8 : f32 to vector<128x128xf32>
    %30 = arith.select %28, %16, %29 : vector<128x128xi1>, vector<128x128xf32>
    %cst_9 = arith.constant 0.000000e+00 : f32
    %31 = vector.broadcast %cst_9 : f32 to vector<128x128xf32>
    %32 = arith.select %28, %21, %31 : vector<128x128xi1>, vector<128x128xf32>
    %33 = arith.fptosi %30 : vector<128x128xf32> to vector<128x128xi8>
    %c0_10 = arith.constant 0 : index
    %c0_11 = arith.constant 0 : index
    %34 = vector.load %arg5[%c0_10, %c0_11] : memref<128x128xi8, #tpu.memory_space<vmem>>, vector<128x128xi8>
    tpu.vector_store %arg5[%c0_10, %c0_11], %33 {strides = array<i32>} : memref<128x128xi8, #tpu.memory_space<vmem>>, vector<128x128xi8>,
    %35 = arith.mulf %1, %30 : vector<128x128xf32>
    %cst_12 = arith.constant dense<0.000000e+00> : vector<128xf32>
    %36 = vector.multi_reduction <add>, %35, %cst_12 [1] : vector<128x128xf32> to vector<128xf32>
    %37 = vector.shape_cast %36 : vector<128xf32> to vector<128x1xf32>
    %cst_13 = arith.constant dense<0.000000e+00> : vector<128xf32>
    %38 = vector.multi_reduction <add>, %30, %cst_13 [1] : vector<128x128xf32> to vector<128xf32>
    %39 = vector.shape_cast %38 : vector<128xf32> to vector<128x1xf32>
    %cst_14 = arith.constant dense<0.000000e+00> : vector<128xf32>
    %40 = vector.multi_reduction <add>, %32, %cst_14 [1] : vector<128x128xf32> to vector<128xf32>
    %41 = vector.shape_cast %40 : vector<128xf32> to vector<128x1xf32>
    %42 = math.log %41 : vector<128x1xf32>
    %cst_15 = arith.constant 14.2857141 : f32
    %43 = vector.broadcast %cst_15 : f32 to vector<128x1xf32>
    %44 = arith.addf %42, %43 : vector<128x1xf32>
    %cst_16 = arith.constant 0.000000e+00 : f32
    %45 = vector.broadcast %cst_16 : f32 to vector<128x1xf32>
    %46 = arith.cmpf ogt, %39, %45 : vector<128x1xf32>
    %cst_17 = arith.constant 14.2857141 : f32
    %47 = vector.broadcast %cst_17 : f32 to vector<128x1xf32>
    %48 = arith.mulf %47, %37 : vector<128x1xf32>
    %49 = arith.divf %48, %39 : vector<128x1xf32>
    %50 = arith.subf %49, %44 : vector<128x1xf32>
    %cst_18 = arith.constant 0.000000e+00 : f32
    %51 = vector.broadcast %cst_18 : f32 to vector<128x1xf32>
    %52 = arith.select %46, %50, %51 : vector<128x1xi1>, vector<128x1xf32>
    %cst_19 = arith.constant dense<0.000000e+00> : vector<1xf32>
    %53 = vector.multi_reduction <add>, %52, %cst_19 [0] : vector<128x1xf32> to vector<1xf32>
    %54 = vector.shape_cast %53 : vector<1xf32> to vector<1x1xf32>
    %cst_20 = arith.constant dense<0.000000e+00> : vector<128xf32>
    %55 = vector.multi_reduction <add>, %35, %cst_20 [0] : vector<128x128xf32> to vector<128xf32>
    %56 = vector.shape_cast %55 : vector<128xf32> to vector<1x128xf32>
    %cst_21 = arith.constant dense<0.000000e+00> : vector<128xf32>
    %57 = vector.multi_reduction <add>, %30, %cst_21 [0] : vector<128x128xf32> to vector<128xf32>
    %58 = vector.shape_cast %57 : vector<128xf32> to vector<1x128xf32>
    %cst_22 = arith.constant dense<0.000000e+00> : vector<128xf32>
    %59 = vector.multi_reduction <add>, %32, %cst_22 [0] : vector<128x128xf32> to vector<128xf32>
    %60 = vector.shape_cast %59 : vector<128xf32> to vector<1x128xf32>
    %61 = vector.shape_cast %54 : vector<1x1xf32> to vector<1x1xf32>
    %62 = vector.broadcast %61 : vector<1x1xf32> to vector<1x128xf32>
    %c0_23 = arith.constant 0 : index
    %c0_24 = arith.constant 0 : index
    %63 = vector.load %arg4[%c0_23, %c0_24] : memref<4x128xf32, #tpu.memory_space<vmem>>, vector<1x128xf32>
    tpu.vector_store %arg4[%c0_23, %c0_24], %56 {strides = array<i32>} : memref<4x128xf32, #tpu.memory_space<vmem>>, vector<1x128xf32>,
    %c1 = arith.constant 1 : index
    %c0_25 = arith.constant 0 : index
    %64 = vector.load %arg4[%c1, %c0_25] : memref<4x128xf32, #tpu.memory_space<vmem>>, vector<1x128xf32>
    tpu.vector_store %arg4[%c1, %c0_25], %58 {strides = array<i32>} : memref<4x128xf32, #tpu.memory_space<vmem>>, vector<1x128xf32>,
    %c2 = arith.constant 2 : index
    %c0_26 = arith.constant 0 : index
    %65 = vector.load %arg4[%c2, %c0_26] : memref<4x128xf32, #tpu.memory_space<vmem>>, vector<1x128xf32>
    tpu.vector_store %arg4[%c2, %c0_26], %60 {strides = array<i32>} : memref<4x128xf32, #tpu.memory_space<vmem>>, vector<1x128xf32>,
    %c3 = arith.constant 3 : index
    %c0_27 = arith.constant 0 : index
    %66 = vector.load %arg4[%c3, %c0_27] : memref<4x128xf32, #tpu.memory_space<vmem>>, vector<1x128xf32>
    tpu.vector_store %arg4[%c3, %c0_27], %62 {strides = array<i32>} : memref<4x128xf32, #tpu.memory_space<vmem>>, vector<1x128xf32>,
    return
  }
  func.func @transform_0(%arg0: i32) -> (i32, i32) {
    %c0_i32 = arith.constant 0 : i32
    %c0_i32_0 = arith.constant 0 : i32
    return %arg0, %c0_i32 : i32, i32
  }
  func.func @transform_1(%arg0: i32) -> (i32, i32) {
    %c0_i32 = arith.constant 0 : i32
    %c0_i32_0 = arith.constant 0 : i32
    return %arg0, %c0_i32 : i32, i32
  }
  func.func @transform_2(%arg0: i32) -> (i32, i32) {
    %c0_i32 = arith.constant 0 : i32
    %c0_i32_0 = arith.constant 0 : i32
    return %arg0, %c0_i32 : i32, i32
  }
  func.func @transform_3(%arg0: i32) -> (i32, i32) {
    %c0_i32 = arith.constant 0 : i32
    %c0_i32_0 = arith.constant 0 : i32
    return %c0_i32, %arg0 : i32, i32
  }
  func.func @transform_4(%arg0: i32) -> (i32, i32) {
    %c0_i32 = arith.constant 0 : i32
    %c0_i32_0 = arith.constant 0 : i32
    return %arg0, %c0_i32 : i32, i32
  }
}

</mosaic_0001>

<bundles_post_ra>
// kernel: tpu_custom_call.1
= control target key start
LH: loop header
LB: loop body
LE: loop exit
PB: predicated region body
PF: predicated region fallthrough
CT: control target
= control target key end

     0   :  { %10 = vsyncpa [#allocation3], 0  ;;  %s1335_s0 = inlined_call_operand.hbm [shape: bf16[128,128], index: 0, kind: input, shape index: {}]   ;;  %s1336_s1 = inlined_call_operand.hbm [shape: s8[128,128], index: 1, kind: input, shape index: {}]   ;;  %s1337_s2 = inlined_call_operand.hbm [shape: s8[128,128], index: 2, kind: input, shape index: {}]   ;;  %s1338_s3 = inlined_call_operand.hbm [shape: f32[4,128], index: 3, kind: output, shape index: {0}]   ;;  %s1339_s4 = inlined_call_operand.hbm [shape: s8[128,128], index: 4, kind: output, shape index: {1}]  }
   0x1   :  { %11 = vsyncpa [#allocation6], 0 }
   0x2   :  { %12 = vsyncpa [#allocation4], 0 }
   0x3   :  { %13 = vsyncpa [#allocation10], 0  ;;  %s1098_s15 = smov [#allocation5]   ;;  %s980_s19 = scalar_lea.hbm %s1336_s1, 512 }
   0x4   :  { %s31_s16 = sshll.u32 %s1098_s15, 4  ;;  %p981_p0 = scmp.ne.s32.totalorder %s1336_s1, %s980_s19  ;;  %s32_s16 = int_to_ptr.vmem [resolvable:$true] %s31_s16 }
   0x5   :  { %p984_p1 = scmp.lt.u32.totalorder %s980_s19, %s1336_s1 }
   0x7   :  { %p986_p2 = pnand %p984_p1, %p981_p0 }
   0x9   :  { %989 = shalt.err (!%p986_p2)
}
   0xa   :  { %s990_s24 = scalar_lea.vmem %s32_s16, 512  ;;  %p995_p4 = scmp.lt.s32.totalorder %s32_s16, %s32_s16 }
   0xb   :  { %p991_p3 = scmp.ne.s32.totalorder %s32_s16, %s990_s24  ;;  %p996_p5 = scmp.lt.s32.totalorder %s990_s24, %s990_s24 }
   0xd   :  { %p997_p6 = por %p996_p5, %p995_p4 }
   0xf   :  { %p998_p7 = pnand %p997_p6, %p991_p3 }
  0x11   :  { %1001 = shalt.err (!%p998_p7)
}
  0x12   :  { %s1099_s25 = smov 128   ;;  %s1100_s26 = smov 8  }
  0x13   :  { %37 = dma.hbm_to_vmem [thread:$0]  %s1336_s1, 512, %s32_s16, [#allocation6], %s1099_s25, %s1099_s25, %s1100_s26  }
  0x14   :  { %s1101_s29 = smov [#allocation2]   ;;  %s1002_s7 = scalar_lea.hbm %s1335_s0, 1024 }
  0x15   :  { %s19_s30 = sshll.u32 %s1101_s29, 4  ;;  %p1003_p8 = scmp.ne.s32.totalorder %s1335_s0, %s1002_s7  ;;  %s20_s30 = int_to_ptr.vmem [resolvable:$true] %s19_s30 }
  0x16   :  { %p1006_p9 = scmp.lt.u32.totalorder %s1002_s7, %s1335_s0 }
  0x18   :  { %p1008_p10 = pnand %p1006_p9, %p1003_p8 }
  0x1a   :  { %1011 = shalt.err (!%p1008_p10)
}
  0x1b   :  { %s1012_s12 = scalar_lea.vmem %s20_s30, 1024  ;;  %p1017_p12 = scmp.lt.s32.totalorder %s20_s30, %s20_s30 }
  0x1c   :  { %p1013_p11 = scmp.ne.s32.totalorder %s20_s30, %s1012_s12  ;;  %p1018_p13 = scmp.lt.s32.totalorder %s1012_s12, %s1012_s12 }
  0x1e   :  { %p1019_p0 = por %p1018_p13, %p1017_p12 }
  0x20   :  { %p1020_p1 = pnand %p1019_p0, %p1013_p11 }
  0x22   :  { %1023 = shalt.err (!%p1020_p1)
}
  0x23   :  { %s1102_s1 = smov 64   ;;  %s1103_s13 = smov 4  }
  0x24   :  { %25 = dma.hbm_to_vmem [thread:$0]  %s1335_s0, 1024, %s20_s30, [#allocation3], %s1102_s1, %s1102_s1, %s1103_s13  }
  0x25   :  { %s1104_s16 = smov [#allocation7]   ;;  %s1024_s20 = scalar_lea.hbm %s1337_s2, 512 }
  0x26   :  { %s43_s17 = sshll.u32 %s1104_s16, 4  ;;  %p1025_p2 = scmp.ne.s32.totalorder %s1337_s2, %s1024_s20  ;;  %s44_s17 = int_to_ptr.vmem [resolvable:$true] %s43_s17 }
  0x27   :  { %p1028_p3 = scmp.lt.u32.totalorder %s1024_s20, %s1337_s2 }
  0x29   :  { %p1030_p4 = pnand %p1028_p3, %p1025_p2 }
  0x2b   :  { %1033 = shalt.err (!%p1030_p4)
}
  0x2c   :  { %s1034_s27 = scalar_lea.vmem %s44_s17, 512  ;;  %p1039_p6 = scmp.lt.s32.totalorder %s44_s17, %s44_s17 }
  0x2d   :  { %p1035_p5 = scmp.ne.s32.totalorder %s44_s17, %s1034_s27  ;;  %p1040_p7 = scmp.lt.s32.totalorder %s1034_s27, %s1034_s27 }
  0x2f   :  { %p1041_p8 = por %p1040_p7, %p1039_p6 }
  0x31   :  { %p1042_p9 = pnand %p1041_p8, %p1035_p5 }
  0x33   :  { %1045 = shalt.err (!%p1042_p9)
}
  0x34   :  { %49 = dma.hbm_to_vmem [thread:$0]  %s1337_s2, 512, %s44_s17, [#allocation6], %s1099_s25, %s1099_s25, %s1100_s26  }
  0x35   :  { %1090 = dma.done.wait [#allocation3], 1024  }
  0x36   :  { %1091 = vsyncadd [#allocation3], 4294966272 }
  0x37   :  { %1092 = dma.done.wait [#allocation6], 1024  }
  0x38   :  { %1093 = vsyncadd [#allocation6], 4294966272  ;;  %v1105_v0 = vmov 0.0   ;;  %v179_v1 = vlaneseq  ;;  %v91_v3 = vld [vmem:[#allocation5] sm:$0xff]  ;;  %v895_v20 = vld [vmem:[#allocation2 + $0x8] sm:$0xff]   ;;  %s1106_s2 = smov [#allocation9]  }
  0x39   :  { %523 = vadd.xlane.f32.xlu1 %v1105_v0  ;;  %555 = vadd.xlane.f32.xlu0 %v1105_v0  ;;  %v127_v4 = vld [vmem:[#allocation7] sm:$0xff]  ;;  %v95_v8 = vunpack.c.0.s8 %v91_v3  ;;  %v96_v10 = vunpack.c.1.s8 %v91_v3  ;;  %v869_v27 = vunpack.c.l.bf16 %v895_v20  ;;  %v896_v35 = vld [vmem:[#allocation2 + $0x10] sm:$0xff]   ;;  %v870_v38 = vunpack.c.h.bf16 %v895_v20  ;;  %v897_v43 = vld [vmem:[#allocation2 + $0x18] sm:$0xff]   ;;  %s830_s29 = sshll.u32 %s1106_s2, 4  ;;  %s831_s29 = int_to_ptr.vmem [resolvable:$true] %s830_s29 }
  0x3a   :  { %v182_v2 = vshrl.u32 %v179_v1, 7  ;;  %v1179_v5 = vand.u32 127, %v179_v1  ;;  %v864_v7 = vld [vmem:[#allocation2] sm:$0xff]   ;;  %v131_v9 = vunpack.c.0.s8 %v127_v4  ;;  %v132_v11 = vunpack.c.1.s8 %v127_v4  ;;  %v899_v60 = vld [vmem:[#allocation2 + $0x28] sm:$0xff]   ;;  %s1046_s30 = scalar_lea.vmem %s831_s29, 512  ;;  %p1051_p11 = scmp.lt.s32.totalorder %s831_s29, %s831_s29 }
  0x3b   :  { %v866_v12 = vunpack.c.h.bf16 %v864_v7  ;;  %v865_v13 = vunpack.c.l.bf16 %v864_v7  ;;  %v111_v14 = vcvt.s32.f32 %v95_v8  ;;  %v112_v16 = vcvt.s32.f32 %v96_v10  ;;  %v898_v51 = vld [vmem:[#allocation2 + $0x20] sm:$0xff]   ;;  %v900_v8 = vld [vmem:[#allocation2 + $0x30] sm:$0xff]   ;;  %p1047_p10 = scmp.ne.s32.totalorder %s831_s29, %s1046_s30  ;;  %p1052_p12 = scmp.lt.s32.totalorder %s1046_s30, %s1046_s30 }
  0x3c   :  { %v183_v6 = vadd.s32 8, %v182_v2  ;;  %v147_v15 = vcvt.s32.f32 %v131_v9  ;;  %v148_v17 = vcvt.s32.f32 %v132_v11  ;;  %vm216_vm0 = vcmp.eq.s32.totalorder %v1179_v5, %v182_v2 }
  0x3d   :  { %525 = vadd.xlane.f32.xlu1 %v1105_v0  ;;  %557 = vadd.xlane.f32.xlu0 %v1105_v0  ;;  %v848_v18 = vadd.f32 -1.0, %v866_v12  ;;  %v847_v19 = vadd.f32 -1.0, %v865_v13  ;;  %vm328_vm2 = vcmp.lt.s32.totalorder %v1179_v5, 16  ;;  %v473_v41 = vmul.f32 0.0, %v869_v27  ;;  %p1053_p13 = por %p1052_p12, %p1051_p11 }
  0x3e   :  { %vm217_vm1 = vcmp.eq.s32.totalorder %v1179_v5, %v183_v6  ;;  %v163_v21 = vmul.f32 %v147_v15, %v111_v14  ;;  %v164_v22 = vmul.f32 %v148_v17, %v112_v16  ;;  %v873_v42 = vunpack.c.l.bf16 %v896_v35  ;;  %v901_v16 = vld [vmem:[#allocation2 + $0x38] sm:$0xff]  }
  0x3f   :  { %v265_v23 = vmul.f32 14.285714, %v848_v18  ;;  %v264_v24 = vmul.f32 14.285714, %v847_v19  ;;  %v474_v45 = vmul.f32 0.0, %v870_v38  ;;  %v874_v46 = vunpack.c.h.bf16 %v896_v35  ;;  %p1054_p0 = pnand %p1053_p13, %p1047_p10 }
  0x40   :  { %v232_v25 = vsel %vm216_vm0, 1.0, %v163_v21  ;;  %v233_v26 = vsel %vm217_vm1, 1.0, %v164_v22  ;;  %v475_v48 = vmul.f32 0.0, %v873_v42  ;;  %v877_v49 = vunpack.c.l.bf16 %v897_v43 }
  0x41   :  { %527 = vadd.xlane.f32.xlu1 %v1105_v0  ;;  %559 = vadd.xlane.f32.xlu0 %v1105_v0  ;;  %v379_v28 = vsel %vm328_vm2, %v232_v25, 0.0  ;;  %v380_v29 = vsel %vm328_vm2, %v233_v26, 0.0  ;;  %v282_v30 = vmul.f32 1.442695, %v265_v23  ;;  %v280_v31 = vmul.f32 1.442695, %v264_v24 }
  0x42   :  { %v411_v32 = vtrunc.f32 %v379_v28  ;;  %v412_v33 = vtrunc.f32 %v380_v29  ;;  %v1191_v34 = vadd.f32 %v380_v29, %v379_v28  ;;  %v472_v36 = vmul.f32 %v866_v12, %v380_v29 }
  0x43   :  { %912 = vpow2.f32 %v282_v30  ;;  %v471_v37 = vmul.f32 %v865_v13, %v379_v28  ;;  %v878_v50 = vunpack.c.h.bf16 %v897_v43  ;;  %v1197_v53 = vmul.f32 0.0, %v874_v46 }
  0x44   :  { %v1194_v39 = vpack.c.f32.eXmY %v411_v32, %v412_v33, 312  ;;  %914 = vpow2.f32 %v280_v31  ;;  %v1200_v56 = vmul.f32 0.0, %v877_v49  ;;  %v881_v57 = vunpack.c.l.bf16 %v898_v51 }
  0x45   :  { %561 = vadd.xlane.f32.xlu0 %v1105_v0  ;;  %519 = vadd.xlane.f32.xlu1 %v379_v28  ;;  %v748_v40 = vadd.f32 %v472_v36, %v471_v37  ;;  %v1202_v59 = vmul.f32 0.0, %v878_v50  ;;  %v882_v1 = vunpack.c.h.bf16 %v898_v51  ;;  %v885_v6 = vunpack.c.l.bf16 %v899_v60 }
  0x46   :  { %v479_v4 = vmul.f32 0.0, %v881_v57  ;;  %v886_v11 = vunpack.c.h.bf16 %v899_v60  ;;  %v889_v14 = vunpack.c.l.bf16 %v900_v8  ;;  %v890_v19 = vunpack.c.h.bf16 %v900_v8 }
  0x47   :  { %v749_v44 = vadd.f32 %v748_v40, %v473_v41  ;;  %v480_v10 = vmul.f32 0.0, %v882_v1  ;;  %v481_v13 = vmul.f32 0.0, %v885_v6  ;;  %v893_v23 = vunpack.c.l.bf16 %v901_v16 }
  0x48   :  { %v482_v18 = vmul.f32 0.0, %v886_v11  ;;  %v483_v22 = vmul.f32 0.0, %v889_v14  ;;  %v484_v25 = vmul.f32 0.0, %v890_v19  ;;  %v894_v27 = vunpack.c.h.bf16 %v901_v16 }
  0x49   :  { %563 = vadd.xlane.f32.xlu0 %v1105_v0  ;;  %521 = vadd.xlane.f32.xlu1 %v380_v29  ;;  %v750_v47 = vadd.f32 %v749_v44, %v474_v45  ;;  %v485_v29 = vmul.f32 0.0, %v893_v23  ;;  %v784_v42 = vrot.slane %v1191_v34, 4 }
  0x4a   :  { %v486_v32 = vmul.f32 0.0, %v894_v27 }
  0x4b   :  { %v751_v52 = vadd.f32 %v750_v47, %v475_v48  ;;  %v785_v43 = vadd.f32 %v784_v42, %v1191_v34  ;;  %v431_v47 = vpack.c.f32.eXmY %v1105_v0, %v1105_v0, 312 }
  0x4d   :  { %489 = vadd.xlane.f32.xlu0 %v472_v36  ;;  %529 = vadd.xlane.f32.xlu1 %v1105_v0  ;;  %v913_v54 = vpop.eup %912  ;;  %v752_v55 = vadd.f32 %v751_v52, %v1197_v53  ;;  %v786_v44 = vrot.slane %v785_v43, 2  ;;  %v435_v49 = vpack.c.b8 %v431_v47, %v1194_v39  ;;  %v445_v50 = vpack.c.b8 %v431_v47, %v431_v47 }
  0x4e   :  { %v915_v58 = vpop.eup %914  ;;  %v396_v62 = vsel %vm328_vm2, %v913_v54, 0.0 }
  0x4f   :  { %v395_v61 = vsel %vm328_vm2, %v915_v58, 0.0  ;;  %v753_v63 = vadd.f32 %v752_v55, %v1200_v56  ;;  %467 = vst [vmem:[#allocation9] sm:$0xff] %v435_v49  ;;  %468 = vst [vmem:[#allocation9 + $0x8] sm:$0xff] %v445_v50 }
  0x50   :  { %v790_v2 = vadd.f32 %v396_v62, %v395_v61  ;;  %469 = vst [vmem:[#allocation9 + $0x10] sm:$0xff] %v445_v50  ;;  %470 = vst [vmem:[#allocation9 + $0x18] sm:$0xff] %v445_v50 }
  0x51   :  { %487 = vadd.xlane.f32.xlu1 %v471_v37  ;;  %551 = vadd.xlane.f32.xlu0 %v395_v61  ;;  %v754_v3 = vadd.f32 %v753_v63, %v1202_v59 }
  0x52   :  { %v805_v7 = vrot.slane %v790_v2, 4 }
  0x53   :  { %v755_v9 = vadd.f32 %v754_v3, %v479_v4 }
  0x54   :  { %v806_v12 = vadd.f32 %v805_v7, %v790_v2 }
  0x55   :  { %531 = vadd.xlane.f32.xlu1 %v1105_v0  ;;  %553 = vadd.xlane.f32.xlu0 %v396_v62  ;;  %v756_v5 = vadd.f32 %v755_v9, %v480_v10 }
  0x56   :  { %v807_v15 = vrot.slane %v806_v12, 2 }
  0x57   :  { %v757_v17 = vadd.f32 %v756_v5, %v481_v13 }
  0x58   :  { %v808_v20 = vadd.f32 %v807_v15, %v806_v12 }
  0x59   :  { %491 = vadd.xlane.f32.xlu1 %v473_v41  ;;  %565 = vadd.xlane.f32.xlu0 %v1105_v0  ;;  %v758_v21 = vadd.f32 %v757_v17, %v482_v18 }
  0x5a   :  { %v809_v24 = vrot.slane %v808_v20, 1 }
  0x5b   :  { %v759_v26 = vadd.f32 %v758_v21, %v483_v22 }
  0x5c   :  { %v810_v28 = vadd.f32 %v809_v24, %v808_v20 }
  0x5d   :  { %567 = vadd.xlane.f32.xlu1 %v1105_v0  ;;  %533 = vadd.xlane.f32.xlu0 %v1105_v0  ;;  %v760_v30 = vadd.f32 %v759_v26, %v484_v25 }
  0x5e   :  { %813 = vst [vmem:[#allocation8 + $0x2] sm:$0x1] %v810_v28 }
  0x5f   :  { %v761_v31 = vadd.f32 %v760_v30, %v485_v29 }
  0x61   :  { %535 = vadd.xlane.f32.xlu1 %v1105_v0  ;;  %493 = vadd.xlane.f32.xlu0 %v474_v45  ;;  %v762_v33 = vadd.f32 %v761_v31, %v486_v32  ;;  %v787_v45 = vadd.f32 %v786_v44, %v785_v43 }
  0x63   :  { %v763_v35 = vrot.slane %v762_v33, 4  ;;  %v788_v46 = vrot.slane %v787_v45, 1 }
  0x65   :  { %495 = vadd.xlane.f32.xlu1 %v475_v48  ;;  %569 = vadd.xlane.f32.xlu0 %v1105_v0  ;;  %v764_v36 = vadd.f32 %v763_v35, %v762_v33  ;;  %v789_v48 = vadd.f32 %v788_v46, %v787_v45 }
  0x67   :  { %v765_v37 = vrot.slane %v764_v36, 2  ;;  %812 = vst [vmem:[#allocation8 + $0x1] sm:$0x1] %v789_v48 }
  0x69   :  { %571 = vadd.xlane.f32.xlu1 %v1105_v0  ;;  %537 = vadd.xlane.f32.xlu0 %v1105_v0  ;;  %v766_v38 = vadd.f32 %v765_v37, %v764_v36 }
  0x6b   :  { %v767_v40 = vrot.slane %v766_v38, 1 }
  0x6d   :  { %539 = vadd.xlane.f32.xlu1 %v1105_v0  ;;  %497 = vadd.xlane.f32.xlu0 %v1197_v53  ;;  %v768_v41 = vadd.f32 %v767_v40, %v766_v38 }
  0x6f   :  { %811 = vst [vmem:[#allocation8] sm:$0x1] %v768_v41 }
  0x71   :  { %499 = vadd.xlane.f32.xlu1 %v1200_v56  ;;  %573 = vadd.xlane.f32.xlu0 %v1105_v0 }
  0x75   :  { %575 = vadd.xlane.f32.xlu1 %v1105_v0  ;;  %541 = vadd.xlane.f32.xlu0 %v1105_v0 }
  0x79   :  { %543 = vadd.xlane.f32.xlu1 %v1105_v0  ;;  %501 = vadd.xlane.f32.xlu0 %v1202_v59 }
  0x7d   :  { %503 = vadd.xlane.f32.xlu1 %v479_v4  ;;  %577 = vadd.xlane.f32.xlu0 %v1105_v0 }
  0x81   :  { %579 = vadd.xlane.f32.xlu1 %v1105_v0  ;;  %545 = vadd.xlane.f32.xlu0 %v1105_v0 }
  0x85   :  { %547 = vadd.xlane.f32.xlu1 %v1105_v0  ;;  %505 = vadd.xlane.f32.xlu0 %v480_v10 }
  0x89   :  { %507 = vadd.xlane.f32.xlu1 %v481_v13  ;;  %581 = vadd.xlane.f32.xlu0 %v1105_v0 }
  0x8d   :  { %509 = vadd.xlane.f32.xlu1 %v482_v18  ;;  %549 = vadd.xlane.f32.xlu0 %v1105_v0 }
  0x91   :  { %513 = vadd.xlane.f32.xlu1 %v484_v25  ;;  %511 = vadd.xlane.f32.xlu0 %v483_v22 }
  0x95   :  { %517 = vadd.xlane.f32.xlu1 %v486_v32  ;;  %515 = vadd.xlane.f32.xlu0 %v485_v29 }
  0x96   :  { %1057 = shalt.err (!%p1054_p0)
}
  0x97   :  { %s1058_s7 = scalar_lea.hbm %s1339_s4, 512 }
  0x98   :  { %p1059_p1 = scmp.ne.s32.totalorder %s1339_s4, %s1058_s7  ;;  %p1062_p2 = scmp.lt.u32.totalorder %s1058_s7, %s1339_s4 }
  0x9a   :  { %p1064_p3 = pnand %p1062_p2, %p1059_p1 }
  0x9c   :  { %1067 = shalt.err (!%p1064_p3)
}
  0x9d   :  { %836 = dma.vmem_to_hbm [thread:$0]  %s831_s29, 512, %s1339_s4, [#allocation10], %s1099_s25, %s1099_s25, %s1100_s26  }
  0x9e   :  { %s1107_s4 = smov [#allocation8]  }
  0x9f   :  { %s821_s25 = sshll.u32 %s1107_s4, 4  ;;  %s822_s25 = int_to_ptr.vmem [resolvable:$true] %s821_s25 }
  0xa0   :  { %s1068_s26 = scalar_lea.vmem %s822_s25, 64  ;;  %p1073_p5 = scmp.lt.s32.totalorder %s822_s25, %s822_s25 }
  0xa1   :  { %p1069_p4 = scmp.ne.s32.totalorder %s822_s25, %s1068_s26  ;;  %p1074_p6 = scmp.lt.s32.totalorder %s1068_s26, %s1068_s26 }
  0xa3   :  { %p1075_p7 = por %p1074_p6, %p1073_p5 }
  0xa5   :  { %p1076_p8 = pnand %p1075_p7, %p1069_p4 }
  0xc6   :  { %v1252_v0 = vpop.xlane.xlu1 %523  ;;  %v556_v34 = vpop.xlane.xlu0 %555 }
  0xc7   :  { %916 = vrcp.f32 %v1252_v0  ;;  %vm633_vm5 = vcmp.gt.f32.partialorder %v1252_v0, 0.0 }
  0xc8   :  { %918 = vlog2.f32 %v556_v34 }
  0xca   :  { %v1254_v39 = vpop.xlane.xlu1 %525  ;;  %v558_v51 = vpop.xlane.xlu0 %557 }
  0xcb   :  { %920 = vlog2.f32 %v558_v51  ;;  %vm634_vm6 = vcmp.gt.f32.partialorder %v1254_v39, 0.0 }
  0xce   :  { %v560_v52 = vpop.xlane.xlu0 %559  ;;  %v1256_v53 = vpop.xlane.xlu1 %527 }
  0xcf   :  { %vm635_vm7 = vcmp.gt.f32.partialorder %v1256_v53, 0.0 }
  0xd1   :  { %v917_v2 = vpop.eup %916 }
  0xd2   :  { %v1258_v54 = vpop.xlane.xlu0 %561  ;;  %v1260_v55 = vpop.xlane.xlu1 %519 }
  0xd3   :  { %v919_v4 = vpop.eup %918  ;;  %vm631_vm3 = vcmp.gt.f32.partialorder %v1260_v55, 0.0 }
  0xd4   :  { %v588_v15 = vmul.f32 0.6931472, %v919_v4 }
  0xd5   :  { %v921_v6 = vpop.eup %920 }
  0xd6   :  { %v1262_v56 = vpop.xlane.xlu0 %563  ;;  %v522_v57 = vpop.xlane.xlu1 %521  ;;  %v590_v19 = vmul.f32 0.6931472, %v921_v6  ;;  %v617_v28 = vadd.f32 14.285714, %v588_v15 }
  0xd7   :  { %vm632_vm4 = vcmp.gt.f32.partialorder %v522_v57, 0.0 }
  0xd8   :  { %v618_v37 = vadd.f32 14.285714, %v590_v19 }
  0xda   :  { %v1264_v58 = vpop.xlane.xlu1 %529  ;;  %v490_v59 = vpop.xlane.xlu0 %489 }
  0xdb   :  { %v648_v20 = vmul.f32 14.285714, %v490_v59  ;;  %vm636_vm8 = vcmp.gt.f32.partialorder %v1264_v58, 0.0 }
  0xde   :  { %v488_v60 = vpop.xlane.xlu1 %487  ;;  %v552_v61 = vpop.xlane.xlu0 %551 }
  0xdf   :  { %922 = vlog2.f32 %v552_v61  ;;  %v647_v10 = vmul.f32 14.285714, %v488_v60 }
  0xe0   :  { %924 = vlog2.f32 %v560_v52 }
  0xe1   :  { %926 = vrcp.f32 %v1260_v55 }
  0xe2   :  { %v1267_v62 = vpop.xlane.xlu1 %531  ;;  %928 = vrcp.f32 %v522_v57  ;;  %v554_v63 = vpop.xlane.xlu0 %553 }
  0xe3   :  { %930 = vlog2.f32 %v554_v63  ;;  %vm637_vm9 = vcmp.gt.f32.partialorder %v1267_v62, 0.0 }
  0xe4   :  { %932 = vrcp.f32 %v1254_v39 }
  0xe5   :  { %934 = vrcp.f32 %v1256_v53 }
  0xe6   :  { %v492_v1 = vpop.xlane.xlu1 %491  ;;  %v1271_v3 = vpop.xlane.xlu0 %565  ;;  %936 = vlog2.f32 %v1258_v54 }
  0xe7   :  { %v649_v12 = vmul.f32 14.285714, %v492_v1  ;;  %938 = vlog2.f32 %v1262_v56 }
  0xe8   :  { %940 = vlog2.f32 %v1271_v3 }
  0xe9   :  { %v923_v8 = vpop.eup %922  ;;  %v668_v23 = vmul.f32 %v917_v2, %v649_v12  ;;  %942 = vrcp.f32 %v1264_v58 }
  0xea   :  { %v1274_v7 = vpop.xlane.xlu1 %567  ;;  %v925_v9 = vpop.eup %924  ;;  %v584_v11 = vmul.f32 0.6931472, %v923_v8 }
  0xeb   :  { %v1276_v5 = vpop.xlane.xlu0 %533  ;;  %v927_v13 = vpop.eup %926  ;;  %v592_v25 = vmul.f32 0.6931472, %v925_v9  ;;  %v697_v40 = vsub.f32 %v668_v23, %v617_v28  ;;  %944 = vlog2.f32 %v1274_v7 }
  0xec   :  { %v929_v14 = vpop.eup %928  ;;  %v615_v16 = vadd.f32 14.285714, %v584_v11  ;;  %v664_v21 = vmul.f32 %v927_v13, %v647_v10  ;;  %946 = vrcp.f32 %v1267_v62  ;;  %vm638_vm10 = vcmp.gt.f32.partialorder %v1276_v5, 0.0 }
  0xed   :  { %v931_v18 = vpop.eup %930  ;;  %v666_v29 = vmul.f32 %v929_v14, %v648_v20  ;;  %v619_v42 = vadd.f32 14.285714, %v592_v25  ;;  %v713_v50 = vsel %vm633_vm5, %v697_v40, 0.0 }
  0xee   :  { %v1278_v17 = vpop.xlane.xlu1 %535  ;;  %v586_v22 = vmul.f32 0.6931472, %v931_v18  ;;  %v933_v27 = vpop.eup %932  ;;  %v695_v30 = vsub.f32 %v664_v21, %v615_v16 }
  0xef   :  { %v494_v24 = vpop.xlane.xlu0 %493  ;;  %v935_v36 = vpop.eup %934  ;;  %vm639_vm11 = vcmp.gt.f32.partialorder %v1278_v17, 0.0 }
  0xf0   :  { %v650_v26 = vmul.f32 14.285714, %v494_v24  ;;  %v616_v31 = vadd.f32 14.285714, %v586_v22  ;;  %v711_v44 = vsel %vm631_vm3, %v695_v30, 0.0  ;;  %v937_v2 = vpop.eup %936 }
  0xf1   :  { %v939_v4 = vpop.eup %938  ;;  %v594_v8 = vmul.f32 0.6931472, %v937_v2 }
  0xf2   :  { %v496_v32 = vpop.xlane.xlu1 %495  ;;  %v670_v33 = vmul.f32 %v933_v27, %v650_v26  ;;  %v696_v38 = vsub.f32 %v666_v29, %v616_v31  ;;  %v941_v7 = vpop.eup %940  ;;  %v596_v13 = vmul.f32 0.6931472, %v939_v4 }
  0xf3   :  { %v651_v35 = vmul.f32 14.285714, %v496_v32  ;;  %v570_v41 = vpop.xlane.xlu0 %569  ;;  %v943_v10 = vpop.eup %942  ;;  %v598_v18 = vmul.f32 0.6931472, %v941_v7  ;;  %v620_v21 = vadd.f32 14.285714, %v594_v8 }
  0xf4   :  { %v712_v45 = vsel %vm632_vm4, %v696_v38, 0.0  ;;  %v698_v46 = vsub.f32 %v670_v33, %v618_v37  ;;  %948 = vlog2.f32 %v570_v41  ;;  %v621_v28 = vadd.f32 14.285714, %v596_v13 }
  0xf5   :  { %v672_v43 = vmul.f32 %v935_v36, %v651_v35  ;;  %v727_v48 = vadd.f32 %v712_v45, %v711_v44  ;;  %950 = vrcp.f32 %v1276_v5  ;;  %v945_v12 = vpop.eup %944  ;;  %v622_v32 = vadd.f32 14.285714, %v598_v18 }
  0xf6   :  { %v572_v47 = vpop.xlane.xlu1 %571  ;;  %v714_v52 = vsel %vm634_vm6, %v698_v46, 0.0  ;;  %v947_v16 = vpop.eup %946  ;;  %v600_v25 = vmul.f32 0.6931472, %v945_v12 }
  0xf7   :  { %v699_v49 = vsub.f32 %v672_v43, %v619_v42  ;;  %v1282_v34 = vpop.xlane.xlu0 %537  ;;  %v728_v51 = vadd.f32 %v727_v48, %v713_v50  ;;  %952 = vlog2.f32 %v572_v47 }
  0xf8   :  { %954 = vrcp.f32 %v1278_v17  ;;  %v623_v42 = vadd.f32 14.285714, %v600_v25  ;;  %vm640_vm12 = vcmp.gt.f32.partialorder %v1282_v34, 0.0 }
  0xf9   :  { %v715_v55 = vsel %vm635_vm7, %v699_v49, 0.0  ;;  %v729_v59 = vadd.f32 %v728_v51, %v714_v52 }
  0xfa   :  { %v1286_v57 = vpop.xlane.xlu1 %539 }
  0xfb   :  { %v498_v60 = vpop.xlane.xlu0 %497  ;;  %v1288_v61 = vadd.f32 %v729_v59, %v715_v55  ;;  %vm641_vm13 = vcmp.gt.f32.partialorder %v1286_v57, 0.0 }
  0xfc   :  { %v652_v3 = vmul.f32 14.285714, %v498_v60 }
  0xfe   :  { %v500_v63 = vpop.xlane.xlu1 %499  ;;  %v674_v14 = vmul.f32 %v943_v10, %v652_v3  ;;  %v949_v20 = vpop.eup %948 }
  0xff   :  { %v574_v0 = vpop.xlane.xlu0 %573  ;;  %v653_v9 = vmul.f32 14.285714, %v500_v63  ;;  %v951_v24 = vpop.eup %950  ;;  %v602_v33 = vmul.f32 0.6931472, %v949_v20 }
 0x100   :  { %956 = vlog2.f32 %v574_v0  ;;  %v700_v29 = vsub.f32 %v674_v14, %v620_v21 }
 0x101   :  { %958 = vrcp.f32 %v1282_v34  ;;  %v676_v22 = vmul.f32 %v947_v16, %v653_v9  ;;  %v953_v27 = vpop.eup %952  ;;  %v624_v50 = vadd.f32 14.285714, %v602_v33 }
 0x102   :  { %v576_v1 = vpop.xlane.xlu1 %575  ;;  %960 = vrcp.f32 %v1286_v57  ;;  %v955_v31 = vpop.eup %954  ;;  %v604_v43 = vmul.f32 0.6931472, %v953_v27  ;;  %v716_v45 = vsel %vm636_vm8, %v700_v29, 0.0 }
 0x103   :  { %v1294_v39 = vpop.xlane.xlu0 %541  ;;  %962 = vlog2.f32 %v576_v1  ;;  %v701_v37 = vsub.f32 %v676_v22, %v621_v28  ;;  %v731_v63 = vadd.f32 %v1288_v61, %v716_v45 }
 0x104   :  { %964 = vrcp.f32 %v1294_v39  ;;  %vm642_vm14 = vcmp.gt.f32.partialorder %v1294_v39, 0.0 }
 0x105   :  { %v717_v55 = vsel %vm637_vm9, %v701_v37, 0.0 }
 0x106   :  { %v1298_v53 = vpop.xlane.xlu1 %543  ;;  %v732_v4 = vadd.f32 %v731_v63, %v717_v55 }
 0x107   :  { %v502_v54 = vpop.xlane.xlu0 %501  ;;  %vm643_vm15 = vcmp.gt.f32.partialorder %v1298_v53, 0.0 }
 0x108   :  { %v654_v15 = vmul.f32 14.285714, %v502_v54  ;;  %v625_v54 = vadd.f32 14.285714, %v604_v43 }
 0x10a   :  { %v504_v56 = vpop.xlane.xlu1 %503  ;;  %v678_v30 = vmul.f32 %v951_v24, %v654_v15  ;;  %v957_v36 = vpop.eup %956 }
 0x10b   :  { %v578_v6 = vpop.xlane.xlu0 %577  ;;  %v655_v23 = vmul.f32 14.285714, %v504_v56  ;;  %v959_v41 = vpop.eup %958  ;;  %v606_v51 = vmul.f32 0.6931472, %v957_v36 }
 0x10c   :  { %966 = vlog2.f32 %v578_v6  ;;  %v702_v46 = vsub.f32 %v678_v30, %v622_v32  ;;  %v961_v49 = vpop.eup %960 }
 0x10d   :  { %v680_v38 = vmul.f32 %v955_v31, %v655_v23  ;;  %v963_v60 = vpop.eup %962  ;;  %v626_v6 = vadd.f32 14.285714, %v606_v51 }
 0x10e   :  { %v580_v11 = vpop.xlane.xlu1 %579  ;;  %v965_v1 = vpop.eup %964  ;;  %v718_v2 = vsel %vm638_vm10, %v702_v46, 0.0  ;;  %v608_v5 = vmul.f32 0.6931472, %v963_v60 }
 0x10f   :  { %v1304_v19 = vpop.xlane.xlu0 %545  ;;  %968 = vlog2.f32 %v580_v11  ;;  %v703_v59 = vsub.f32 %v680_v38, %v623_v42  ;;  %v733_v61 = vadd.f32 %v732_v4, %v718_v2 }
 0x110   :  { %970 = vrcp.f32 %v1304_v19  ;;  %v627_v25 = vadd.f32 14.285714, %v608_v5  ;;  %vm644_vm0 = vcmp.gt.f32.partialorder %v1304_v19, 0.0 }
 0x111   :  { %972 = vrcp.f32 %v1298_v53  ;;  %v719_v8 = vsel %vm639_vm11, %v703_v59, 0.0 }
 0x112   :  { %v1307_v26 = vpop.xlane.xlu1 %547  ;;  %v734_v18 = vadd.f32 %v733_v61, %v719_v8 }
 0x113   :  { %v506_v35 = vpop.xlane.xlu0 %505  ;;  %vm645_vm1 = vcmp.gt.f32.partialorder %v1307_v26, 0.0 }
 0x114   :  { %v656_v40 = vmul.f32 14.285714, %v506_v35 }
 0x116   :  { %v508_v44 = vpop.xlane.xlu1 %507  ;;  %v682_v47 = vmul.f32 %v959_v41, %v656_v40  ;;  %v967_v3 = vpop.eup %966 }
 0x117   :  { %v657_v48 = vmul.f32 14.285714, %v508_v44  ;;  %v582_v52 = vpop.xlane.xlu0 %581  ;;  %v610_v13 = vmul.f32 0.6931472, %v967_v3 }
 0x118   :  { %974 = vlog2.f32 %v582_v52  ;;  %v704_v56 = vsub.f32 %v682_v47, %v624_v50 }
 0x119   :  { %v684_v58 = vmul.f32 %v961_v49, %v657_v48  ;;  %976 = vrcp.f32 %v1307_v26  ;;  %v969_v12 = vpop.eup %968  ;;  %v628_v29 = vadd.f32 14.285714, %v610_v13 }
 0x11a   :  { %v510_v0 = vpop.xlane.xlu1 %509  ;;  %v720_v14 = vsel %vm640_vm12, %v704_v56, 0.0  ;;  %v971_v17 = vpop.eup %970  ;;  %v612_v30 = vmul.f32 0.6931472, %v969_v12 }
 0x11b   :  { %v658_v62 = vmul.f32 14.285714, %v510_v0  ;;  %v550_v7 = vpop.xlane.xlu0 %549  ;;  %v705_v9 = vsub.f32 %v684_v58, %v625_v54  ;;  %v973_v24 = vpop.eup %972  ;;  %v735_v34 = vadd.f32 %v734_v18, %v720_v14 }
 0x11c   :  { %978 = vrcp.f32 %v550_v7  ;;  %v629_v39 = vadd.f32 14.285714, %v612_v30  ;;  %vm646_vm2 = vcmp.gt.f32.partialorder %v550_v7, 0.0 }
 0x11d   :  { %v686_v10 = vmul.f32 %v965_v1, %v658_v62  ;;  %v721_v21 = vsel %vm641_vm13, %v705_v9, 0.0 }
 0x11e   :  { %v514_v11 = vpop.xlane.xlu1 %513  ;;  %v736_v33 = vadd.f32 %v735_v34, %v721_v21 }
 0x11f   :  { %v706_v15 = vsub.f32 %v686_v10, %v626_v6  ;;  %v660_v16 = vmul.f32 14.285714, %v514_v11  ;;  %v512_v20 = vpop.xlane.xlu0 %511 }
 0x120   :  { %v659_v23 = vmul.f32 14.285714, %v512_v20 }
 0x121   :  { %v690_v22 = vmul.f32 %v971_v17, %v660_v16  ;;  %v722_v31 = vsel %vm642_vm14, %v706_v15, 0.0 }
 0x122   :  { %v518_v27 = vpop.xlane.xlu1 %517  ;;  %v975_v28 = vpop.eup %974  ;;  %v688_v32 = vmul.f32 %v973_v24, %v659_v23  ;;  %v737_v42 = vadd.f32 %v736_v33, %v722_v31 }
 0x123   :  { %v614_v35 = vmul.f32 0.6931472, %v975_v28  ;;  %v516_v36 = vpop.xlane.xlu0 %515  ;;  %v662_v57 = vmul.f32 14.285714, %v518_v27  ;;  %v708_v37 = vsub.f32 %v690_v22, %v628_v29  ;;  %v977_v41 = vpop.eup %976 }
 0x124   :  { %v707_v38 = vsub.f32 %v688_v32, %v627_v25  ;;  %v661_v40 = vmul.f32 14.285714, %v516_v36 }
 0x125   :  { %v630_v46 = vadd.f32 14.285714, %v614_v35  ;;  %v724_v49 = vsel %vm644_vm0, %v708_v37, 0.0 }
 0x126   :  { %v979_v43 = vpop.eup %978  ;;  %v723_v44 = vsel %vm643_vm15, %v707_v38, 0.0  ;;  %v692_v45 = vmul.f32 %v977_v41, %v661_v40 }
 0x127   :  { %v738_v47 = vadd.f32 %v737_v42, %v723_v44  ;;  %v694_v48 = vmul.f32 %v979_v43, %v662_v57 }
 0x128   :  { %v709_v50 = vsub.f32 %v692_v45, %v629_v39 }
 0x129   :  { %v739_v51 = vadd.f32 %v738_v47, %v724_v49  ;;  %v710_v52 = vsub.f32 %v694_v48, %v630_v46 }
 0x12a   :  { %v725_v55 = vsel %vm645_vm1, %v709_v50, 0.0 }
 0x12b   :  { %v740_v59 = vadd.f32 %v739_v51, %v725_v55  ;;  %v726_v53 = vsel %vm646_vm2, %v710_v52, 0.0 }
 0x12d   :  { %v741_v58 = vadd.f32 %v740_v59, %v726_v53 }
 0x12f   :  { %v742_v60 = vrot.slane %v741_v58, 4 }
 0x131   :  { %v743_v63 = vadd.f32 %v742_v60, %v741_v58 }
 0x133   :  { %v744_v0 = vrot.slane %v743_v63, 2 }
 0x135   :  { %v745_v1 = vadd.f32 %v744_v0, %v743_v63 }
 0x137   :  { %v746_v19 = vrot.slane %v745_v1, 1 }
 0x139   :  { %v747_v54 = vadd.f32 %v746_v19, %v745_v1 }
 0x13b   :  { %814 = vst [vmem:[#allocation8 + $0x3] sm:$0x1] %v747_v54 }
 0x13c   :  { %1079 = shalt.err (!%p1076_p8)
}
 0x13d   :  { %s1080_s15 = scalar_lea.hbm %s1338_s3, 64 }
 0x13e   :  { %p1081_p9 = scmp.ne.s32.totalorder %s1338_s3, %s1080_s15  ;;  %p1084_p10 = scmp.lt.u32.totalorder %s1080_s15, %s1338_s3 }
 0x140   :  { %p1086_p11 = pnand %p1084_p10, %p1081_p9 }
 0x142   :  { %1089 = shalt.err (!%p1086_p11)
}
 0x143   :  { %824 = dma.vmem_to_hbm [thread:$0]  %s822_s25, 64, %s1338_s3, [#allocation4]  }
 0x144   :  { %1094 = dma.done.wait [#allocation4], 64  }
 0x145   :  { %1095 = vsyncadd [#allocation4], 4294967232 }
 0x146   :  { %1096 = dma.done.wait [#allocation10], 512  }
 0x147   :  { %1097 = vsyncadd [#allocation10], 4294966784 }
 0x148   :  { %843 = vsyncpa [#allocation3], 1 }
 0x149   :  { %844 = vsyncpa [#allocation6], 1 }
 0x14a   :  { %845 = vsyncpa [#allocation4], 1 }
 0x14b   :  { %846 = vsyncpa [#allocation10], 1 }

</bundles_post_ra>
